<compile_context>
chip_gen: v7x
topology: tpu7x:2x2x1
jax: 0.10.0
libtpu: 0.0.40
codegen_flags: <defaults>
</compile_context>

<pallas_src>
import functools

import jax
import jax.numpy as jnp
import numpy as np
from jax import lax
from jax.experimental import pallas as pl
from jax.experimental.pallas import tpu as pltpu


def _round_up(x, m):
    return ((x + m - 1) // m) * m


def _cdiv(a, b):
    return (a + b - 1) // b


def _fake_quant(x, delta, zp, n_levels):
    """UniformAffine quantizer forward (inited=True path), plain jnp, f32."""
    x_int = jnp.round(x / delta) + zp
    x_q = jnp.clip(x_int, 0.0, float(n_levels - 1))
    return (x_q - zp) * delta


# ---------------------------------------------------------------------------
# Pallas kernel: K-tiled matmul (MXU, f32 accumulate) -> bias -> act fake-quant
# ---------------------------------------------------------------------------
def _quant_conv_kernel(p_ref, w_ref, b_ref, o_ref, acc_ref, *,
                       n_levels, delta_a, zp_a, apply_act_quant):
    k = pl.program_id(1)

    @pl.when(k == 0)
    def _():
        acc_ref[...] = jnp.zeros_like(acc_ref)

    # (tile_m, tile_k) @ (tile_k, OC_pad) on the MXU, f32 accumulation.
    acc_ref[...] += jnp.dot(p_ref[...], w_ref[...],
                            preferred_element_type=jnp.float32)

    @pl.when(k == pl.num_programs(1) - 1)
    def _():
        out = acc_ref[...] + b_ref[...]                # (1, OC_pad) broadcast, f32

        if apply_act_quant:
            # UniformAffineActQuantizer.forward (inited=True), zero-point folded
            # into the clamp bounds; divide keeps PyTorch's exact .5-tie rounding.
            q = jnp.clip(jnp.round(out / delta_a),
                         -zp_a, float(n_levels - 1) - zp_a)
            out = q * delta_a

        o_ref[...] = out.astype(o_ref.dtype)


# ---------------------------------------------------------------------------
# Wrapper: weight fake-quant (hoisted), im2col, padding, pallas_call, reshape
# ---------------------------------------------------------------------------
def quant_module_forward(x, weight, bias, *,
                         padding=1,
                         use_weight_quant=False, use_act_quant=False,
                         disable_act_quant=False,
                         n_bits=8,
                         delta_w=1.0, zp_w=0.0,
                         delta_a=1.0, zp_a=0.0,
                         matmul_dtype=jnp.bfloat16,
                         tile_m_target=512):
    """x: [N, C, H, W] float32 (NCHW); weight: [OC, C, KH, KW]; bias: [OC]."""
    # Conv2d defaults used by this module: stride=1, dilation=1, groups=1.
    N, C, H, W = x.shape
    OC, _, KH, KW = weight.shape
    n_levels = 2 ** n_bits

    # ---- weight fake-quant hoisted out of the grid loop (constant per call) --
    w = weight.astype(jnp.float32)
    if use_weight_quant:
        w = _fake_quant(w, delta_w, zp_w, n_levels)

    # ---- im2col in matmul_dtype (column order = c*KH*KW + kh*KW + kw) --------
    # TODO(synk): replace with in-kernel patch construction from halo'd NHWC
    # windows via manual DMA to avoid the KH*KW-fold HBM read inflation.
    x_m = x.astype(matmul_dtype)
    xp = jnp.pad(x_m, ((0, 0), (0, 0), (padding, padding), (padding, padding)))
    Ho = H + 2 * padding - KH + 1
    Wo = W + 2 * padding - KW + 1
    cols = [xp[:, :, kh:kh + Ho, kw:kw + Wo]
            for kh in range(KH) for kw in range(KW)]             # each [N,C,Ho,Wo]
    patches = jnp.stack(cols, axis=-1)                           # [N,C,Ho,Wo,KH*KW]
    patches = jnp.transpose(patches, (0, 2, 3, 1, 4))            # [N,Ho,Wo,C,KH*KW]
    K = C * KH * KW
    M = N * Ho * Wo
    patches = patches.reshape(M, K)                              # matmul_dtype

    w_mat = w.reshape(OC, K).T.astype(matmul_dtype)              # [K, OC]
    b_row = bias.reshape(1, OC).astype(jnp.float32)              # [1, OC] f32

    itemsize = jnp.dtype(matmul_dtype).itemsize

    # ---- lane-dense padding (full MXU columns, unmasked vst) -----------------
    K_pad = _round_up(K, 128)
    OC_pad = _round_up(OC, 128)

    # ---- generation-aware VMEM budget ----------------------------------------
    try:
        vmem_cap = int(pltpu.get_tpu_info().vmem_capacity_bytes)
    except Exception:
        vmem_cap = 64 << 20          # conservative: v7x has the least VMEM per TC
    vmem_cap_usable = (vmem_cap * 7) // 8          # ~87.5%, headroom for scratch

    # ---- tile_m: large, multiple of 128, even tile count, minimal M padding --
    tile_m_target = max(128, (int(tile_m_target) // 128) * 128)
    num_tiles = max(2, _cdiv(M, tile_m_target))
    num_tiles += num_tiles % 2                                   # even count (2 TCs)
    tile_m = _round_up(_cdiv(M, num_tiles), 128)
    m_tiles = _cdiv(M, tile_m)
    M_pad = m_tiles * tile_m

    # ---- tile_k: keep the whole contraction resident unless the operand slabs
    # would blow the VMEM budget (v7x: 64 MiB); otherwise split K and accumulate.
    epilogue_bytes = 3 * tile_m * OC_pad * 4       # 2 output buffers + accumulator
    slab_budget = max(vmem_cap_usable - epilogue_bytes - (8 << 20), 8 << 20)
    if 2 * tile_m * K_pad * itemsize + 2 * K_pad * OC_pad * itemsize <= slab_budget:
        tile_k = K_pad
    else:
        tile_k = 2048 if itemsize <= 2 else 1024
        while tile_k > 256 and (2 * tile_m * tile_k * itemsize
                                + 2 * tile_k * OC_pad * itemsize) > slab_budget:
            tile_k //= 2
        K_pad = _round_up(K_pad, tile_k)
    k_tiles = K_pad // tile_k

    patches = jnp.pad(patches, ((0, M_pad - M), (0, K_pad - K)))
    w_mat = jnp.pad(w_mat, ((0, K_pad - K), (0, OC_pad - OC)))
    b_row = jnp.pad(b_row, ((0, 0), (0, OC_pad - OC)))

    apply_act_quant = (not disable_act_quant) and use_act_quant
    kernel = functools.partial(
        _quant_conv_kernel,
        n_levels=n_levels, delta_a=float(delta_a), zp_a=float(zp_a),
        apply_act_quant=apply_act_quant)

    # VMEM accounting (double-buffered patches/weight counted conservatively,
    # output double buffer + f32 accumulator), capped at the usable capacity.
    needed = (2 * tile_m * tile_k * itemsize
              + 2 * tile_k * OC_pad * itemsize
              + 2 * OC_pad * 4
              + 2 * tile_m * OC_pad * 4
              + tile_m * OC_pad * 4)
    vmem_limit = int(min(max(needed + (8 << 20), 32 << 20), vmem_cap_usable))

    out_shape = jax.ShapeDtypeStruct((M_pad, OC_pad), jnp.float32)
    p_spec = pl.BlockSpec((tile_m, tile_k), lambda i, k: (i, k))
    out_spec = pl.BlockSpec((tile_m, OC_pad), lambda i, k: (i, 0))
    scratch = [pltpu.VMEM((tile_m, OC_pad), jnp.float32)]
    compiler_params = pltpu.CompilerParams(
        dimension_semantics=("parallel", "arbitrary"),
        vmem_limit_bytes=vmem_limit)

    def run(single_buffer_invariants):
        # Grid-invariant operands are fetched once -> single buffer saves VMEM.
        if single_buffer_invariants and k_tiles == 1:
            w_spec = pl.BlockSpec((tile_k, OC_pad), lambda i, k: (k, 0),
                                  pipeline_mode=pl.Buffered(1))
        else:
            w_spec = pl.BlockSpec((tile_k, OC_pad), lambda i, k: (k, 0))
        if single_buffer_invariants:
            b_spec = pl.BlockSpec((1, OC_pad), lambda i, k: (0, 0),
                                  pipeline_mode=pl.Buffered(1))
        else:
            b_spec = pl.BlockSpec((1, OC_pad), lambda i, k: (0, 0))
        return pl.pallas_call(
            kernel,
            out_shape=out_shape,
            grid_spec=pltpu.PrefetchScalarGridSpec(
                num_scalar_prefetch=0,
                grid=(m_tiles, k_tiles),
                in_specs=[p_spec, w_spec, b_spec],
                out_specs=out_spec,
                scratch_shapes=scratch),
            compiler_params=compiler_params,
        )(patches, w_mat, b_row)

    try:
        out_flat = run(True)
    except Exception:
        # pipeline_mode / Buffered(1) unsupported in this build: identical math
        # with default double buffering (slightly more VMEM).
        out_flat = run(False)

    out = out_flat[:M, :OC].reshape(N, Ho, Wo, OC)
    return jnp.transpose(out, (0, 3, 1, 2))                      # back to NCHW


# ---------------------------------------------------------------------------
# Pure-JAX reference (mirrors the PyTorch forward exactly, f32)
# ---------------------------------------------------------------------------
def _ref_forward(x, weight, bias, *, padding, use_weight_quant, use_act_quant,
                 disable_act_quant, n_bits, delta_w, zp_w, delta_a, zp_a):
    n_levels = 2 ** n_bits
    w = _fake_quant(weight, delta_w, zp_w, n_levels) if use_weight_quant else weight
    out = lax.conv_general_dilated(
        x, w, window_strides=(1, 1),
        padding=[(padding, padding), (padding, padding)],
        dimension_numbers=("NCHW", "OIHW", "NCHW"))
    out = out + bias[None, :, None, None]
    if (not disable_act_quant) and use_act_quant:
        out = _fake_quant(out, delta_a, zp_a, n_levels)
    return out


if __name__ == "__main__":
    key = jax.random.PRNGKey(0)
    kx, kw, kb = jax.random.split(key, 3)

    # Small Conv2d: in_channels=4, out_channels=8, kernel 3x3, stride=1, padding=1
    N, C, H, W = 2, 4, 16, 16
    OC, KH, KW = 8, 3, 3

    x = jax.random.normal(kx, (N, C, H, W), dtype=jnp.float32)
    weight = jax.random.normal(kw, (OC, C, KH, KW), dtype=jnp.float32) * 0.5
    bias = jax.random.normal(kb, (OC,), dtype=jnp.float32) * 0.1

    # (use_weight_quant, use_act_quant, matmul dtype, atol, rtol)
    cases = [
        (False, False, jnp.float32, 1e-3, 1e-3),   # bit-exact f32 path
        (True,  True,  jnp.float32, 1e-3, 1e-3),   # f32 path, both quantizers
        (False, False, jnp.bfloat16, 1e-1, 5e-2),  # default bf16-MXU path
        (True,  False, jnp.bfloat16, 1e-1, 5e-2),  # bf16-MXU path, weight quant
    ]

    ok = True
    for wq, aq, mdt, atol, rtol in cases:
        out = quant_module_forward(
            x, weight, bias, padding=1,
            use_weight_quant=wq, use_act_quant=aq, disable_act_quant=False,
            n_bits=8, delta_w=1.0, zp_w=0.0, delta_a=1.0, zp_a=0.0,
            matmul_dtype=mdt)
        out = jax.block_until_ready(out)
        ref = _ref_forward(
            x, weight, bias, padding=1,
            use_weight_quant=wq, use_act_quant=aq, disable_act_quant=False,
            n_bits=8, delta_w=1.0, zp_w=0.0, delta_a=1.0, zp_a=0.0)
        ref = jax.block_until_ready(ref)
        if not np.allclose(np.asarray(out), np.asarray(ref), atol=atol, rtol=rtol):
            ok = False

    if ok:
        print("KERNEL_OK")
</pallas_src>

<mosaic_0001>
module attributes {stable_mosaic.version = 11 : i64} {
  func.func @_quant_conv_kernel(%arg0: i32, %arg1: i32, %arg2: memref<256x128xf32, #tpu.memory_space<vmem>>, %arg3: memref<128x128xf32, #tpu.memory_space<vmem>>, %arg4: memref<1x128xf32, #tpu.memory_space<vmem>>, %arg5: memref<256x128xf32, #tpu.memory_space<vmem>>, %arg6: memref<256x128xf32, #tpu.memory_space<vmem>>) attributes {dimension_semantics = [#tpu.dimension_semantics<parallel>, #tpu.dimension_semantics<arbitrary>], iteration_bounds = array<i64: 2, 1>, scalar_prefetch = 0 : i64, scratch_operands = 1 : i64, tpu.core_type = #tpu.core_type<tc>, window_params = [{transform_indices = @transform_0, window_bounds = array<i64: 256, 128>}, {pipeline_mode = #tpu.pipeline_mode<synchronous>, transform_indices = @transform_1, window_bounds = array<i64: 128, 128>}, {pipeline_mode = #tpu.pipeline_mode<synchronous>, transform_indices = @transform_2, window_bounds = array<i64: 1, 128>}, {transform_indices = @transform_3, window_bounds = array<i64: 256, 128>}]} {
    %c0_i32 = arith.constant 0 : i32
    %0 = arith.cmpi eq, %arg1, %c0_i32 : i32
    %1 = arith.extui %0 : i1 to i32
    %c0_i32_0 = arith.constant 0 : i32
    %2 = arith.cmpi ne, %1, %c0_i32_0 : i32
    scf.if %2 {
      %cst_10 = arith.constant 0.000000e+00 : f32
      %12 = vector.broadcast %cst_10 : f32 to vector<256x128xf32>
      %c0_11 = arith.constant 0 : index
      %c0_12 = arith.constant 0 : index
      %13 = vector.load %arg6[%c0_11, %c0_12] : memref<256x128xf32, #tpu.memory_space<vmem>>, vector<256x128xf32>
      tpu.vector_store %arg6[%c0_11, %c0_12], %12 {strides = array<i32>} : memref<256x128xf32, #tpu.memory_space<vmem>>, vector<256x128xf32>,
    } else {
    }
    %c0 = arith.constant 0 : index
    %c0_1 = arith.constant 0 : index
    %3 = vector.load %arg6[%c0, %c0_1] : memref<256x128xf32, #tpu.memory_space<vmem>>, vector<256x128xf32>
    %c0_2 = arith.constant 0 : index
    %c0_3 = arith.constant 0 : index
    %4 = vector.load %arg2[%c0_2, %c0_3] : memref<256x128xf32, #tpu.memory_space<vmem>>, vector<256x128xf32>
    %c0_4 = arith.constant 0 : index
    %c0_5 = arith.constant 0 : index
    %5 = vector.load %arg3[%c0_4, %c0_5] : memref<128x128xf32, #tpu.memory_space<vmem>>, vector<128x128xf32>
    %cst = arith.constant dense<0.000000e+00> : vector<256x128xf32>
    %6 = tpu.matmul %4, %5, %cst {dimension_numbers = #tpu.dot_dimension_numbers<[1], [0], [0], [1], [0, 0, 1, 1], [], []>} : vector<256x128xf32>, vector<128x128xf32>, vector<256x128xf32> -> vector<256x128xf32>
    %7 = arith.addf %3, %6 : vector<256x128xf32>
    %c0_6 = arith.constant 0 : index
    %c0_7 = arith.constant 0 : index
    %8 = vector.load %arg6[%c0_6, %c0_7] : memref<256x128xf32, #tpu.memory_space<vmem>>, vector<256x128xf32>
    tpu.vector_store %arg6[%c0_6, %c0_7], %7 {strides = array<i32>} : memref<256x128xf32, #tpu.memory_space<vmem>>, vector<256x128xf32>,
    %c0_i32_8 = arith.constant 0 : i32
    %9 = arith.cmpi eq, %arg1, %c0_i32_8 : i32
    %10 = arith.extui %9 : i1 to i32
    %c0_i32_9 = arith.constant 0 : i32
    %11 = arith.cmpi ne, %10, %c0_i32_9 : i32
    scf.if %11 {
      %c0_10 = arith.constant 0 : index
      %c0_11 = arith.constant 0 : index
      %12 = vector.load %arg6[%c0_10, %c0_11] : memref<256x128xf32, #tpu.memory_space<vmem>>, vector<256x128xf32>
      %c0_12 = arith.constant 0 : index
      %c0_13 = arith.constant 0 : index
      %13 = vector.load %arg4[%c0_12, %c0_13] : memref<1x128xf32, #tpu.memory_space<vmem>>, vector<1x128xf32>
      %14 = vector.broadcast %13 : vector<1x128xf32> to vector<256x128xf32>
      %15 = arith.addf %12, %14 : vector<256x128xf32>
      %c0_14 = arith.constant 0 : index
      %c0_15 = arith.constant 0 : index
      %16 = vector.load %arg5[%c0_14, %c0_15] : memref<256x128xf32, #tpu.memory_space<vmem>>, vector<256x128xf32>
      tpu.vector_store %arg5[%c0_14, %c0_15], %15 {strides = array<i32>} : memref<256x128xf32, #tpu.memory_space<vmem>>, vector<256x128xf32>,
    } else {
    }
    return
  }
  func.func @transform_0(%arg0: i32, %arg1: i32) -> (i32, i32) {
    %c0_i32 = arith.constant 0 : i32
    return %arg0, %arg1 : i32, i32
  }
  func.func @transform_1(%arg0: i32, %arg1: i32) -> (i32, i32) {
    %c0_i32 = arith.constant 0 : i32
    %c0_i32_0 = arith.constant 0 : i32
    return %arg1, %c0_i32 : i32, i32
  }
  func.func @transform_2(%arg0: i32, %arg1: i32) -> (i32, i32) {
    %c0_i32 = arith.constant 0 : i32
    %c0_i32_0 = arith.constant 0 : i32
    %c0_i32_1 = arith.constant 0 : i32
    return %c0_i32, %c0_i32_0 : i32, i32
  }
  func.func @transform_3(%arg0: i32, %arg1: i32) -> (i32, i32) {
    %c0_i32 = arith.constant 0 : i32
    %c0_i32_0 = arith.constant 0 : i32
    return %arg0, %c0_i32 : i32, i32
  }
}

module attributes {stable_mosaic.version = 11 : i64} {
  func.func @_quant_conv_kernel(%arg0: i32, %arg1: i32, %arg2: memref<256x128xf32, #tpu.memory_space<vmem>>, %arg3: memref<128x128xf32, #tpu.memory_space<vmem>>, %arg4: memref<1x128xf32, #tpu.memory_space<vmem>>, %arg5: memref<256x128xf32, #tpu.memory_space<vmem>>, %arg6: memref<256x128xf32, #tpu.memory_space<vmem>>) attributes {dimension_semantics = [#tpu.dimension_semantics<parallel>, #tpu.dimension_semantics<arbitrary>], iteration_bounds = array<i64: 2, 1>, scalar_prefetch = 0 : i64, scratch_operands = 1 : i64, tpu.core_type = #tpu.core_type<tc>, window_params = [{transform_indices = @transform_0, window_bounds = array<i64: 256, 128>}, {transform_indices = @transform_1, window_bounds = array<i64: 128, 128>}, {pipeline_mode = #tpu.pipeline_mode<synchronous>, transform_indices = @transform_2, window_bounds = array<i64: 1, 128>}, {transform_indices = @transform_3, window_bounds = array<i64: 256, 128>}]} {
    %c0_i32 = arith.constant 0 : i32
    %0 = arith.cmpi eq, %arg1, %c0_i32 : i32
    %1 = arith.extui %0 : i1 to i32
    %c0_i32_0 = arith.constant 0 : i32
    %2 = arith.cmpi ne, %1, %c0_i32_0 : i32
    scf.if %2 {
      %cst_10 = arith.constant 0.000000e+00 : f32
      %12 = vector.broadcast %cst_10 : f32 to vector<256x128xf32>
      %c0_11 = arith.constant 0 : index
      %c0_12 = arith.constant 0 : index
      %13 = vector.load %arg6[%c0_11, %c0_12] : memref<256x128xf32, #tpu.memory_space<vmem>>, vector<256x128xf32>
      tpu.vector_store %arg6[%c0_11, %c0_12], %12 {strides = array<i32>} : memref<256x128xf32, #tpu.memory_space<vmem>>, vector<256x128xf32>,
    } else {
    }
    %c0 = arith.constant 0 : index
    %c0_1 = arith.constant 0 : index
    %3 = vector.load %arg6[%c0, %c0_1] : memref<256x128xf32, #tpu.memory_space<vmem>>, vector<256x128xf32>
    %c0_2 = arith.constant 0 : index
    %c0_3 = arith.constant 0 : index
    %4 = vector.load %arg2[%c0_2, %c0_3] : memref<256x128xf32, #tpu.memory_space<vmem>>, vector<256x128xf32>
    %c0_4 = arith.constant 0 : index
    %c0_5 = arith.constant 0 : index
    %5 = vector.load %arg3[%c0_4, %c0_5] : memref<128x128xf32, #tpu.memory_space<vmem>>, vector<128x128xf32>
    %cst = arith.constant dense<0.000000e+00> : vector<256x128xf32>
    %6 = tpu.matmul %4, %5, %cst {dimension_numbers = #tpu.dot_dimension_numbers<[1], [0], [0], [1], [0, 0, 1, 1], [], []>} : vector<256x128xf32>, vector<128x128xf32>, vector<256x128xf32> -> vector<256x128xf32>
    %7 = arith.addf %3, %6 : vector<256x128xf32>
    %c0_6 = arith.constant 0 : index
    %c0_7 = arith.constant 0 : index
    %8 = vector.load %arg6[%c0_6, %c0_7] : memref<256x128xf32, #tpu.memory_space<vmem>>, vector<256x128xf32>
    tpu.vector_store %arg6[%c0_6, %c0_7], %7 {strides = array<i32>} : memref<256x128xf32, #tpu.memory_space<vmem>>, vector<256x128xf32>,
    %c0_i32_8 = arith.constant 0 : i32
    %9 = arith.cmpi eq, %arg1, %c0_i32_8 : i32
    %10 = arith.extui %9 : i1 to i32
    %c0_i32_9 = arith.constant 0 : i32
    %11 = arith.cmpi ne, %10, %c0_i32_9 : i32
    scf.if %11 {
      %c0_10 = arith.constant 0 : index
      %c0_11 = arith.constant 0 : index
      %12 = vector.load %arg6[%c0_10, %c0_11] : memref<256x128xf32, #tpu.memory_space<vmem>>, vector<256x128xf32>
      %c0_12 = arith.constant 0 : index
      %c0_13 = arith.constant 0 : index
      %13 = vector.load %arg4[%c0_12, %c0_13] : memref<1x128xf32, #tpu.memory_space<vmem>>, vector<1x128xf32>
      %14 = vector.broadcast %13 : vector<1x128xf32> to vector<256x128xf32>
      %15 = arith.addf %12, %14 : vector<256x128xf32>
      %c0_14 = arith.constant 0 : index
      %c0_15 = arith.constant 0 : index
      %16 = vector.load %arg5[%c0_14, %c0_15] : memref<256x128xf32, #tpu.memory_space<vmem>>, vector<256x128xf32>
      tpu.vector_store %arg5[%c0_14, %c0_15], %15 {strides = array<i32>} : memref<256x128xf32, #tpu.memory_space<vmem>>, vector<256x128xf32>,
    } else {
    }
    return
  }
  func.func @transform_0(%arg0: i32, %arg1: i32) -> (i32, i32) {
    %c0_i32 = arith.constant 0 : i32
    return %arg0, %arg1 : i32, i32
  }
  func.func @transform_1(%arg0: i32, %arg1: i32) -> (i32, i32) {
    %c0_i32 = arith.constant 0 : i32
    %c0_i32_0 = arith.constant 0 : i32
    return %arg1, %c0_i32 : i32, i32
  }
  func.func @transform_2(%arg0: i32, %arg1: i32) -> (i32, i32) {
    %c0_i32 = arith.constant 0 : i32
    %c0_i32_0 = arith.constant 0 : i32
    %c0_i32_1 = arith.constant 0 : i32
    return %c0_i32, %c0_i32_0 : i32, i32
  }
  func.func @transform_3(%arg0: i32, %arg1: i32) -> (i32, i32) {
    %c0_i32 = arith.constant 0 : i32
    %c0_i32_0 = arith.constant 0 : i32
    return %arg0, %c0_i32 : i32, i32
  }
}

</mosaic_0001>

<bundles_post_ra>
// kernel: tpu_custom_call.1
= control target key start
LH: loop header
LB: loop body
LE: loop exit
PB: predicated region body
PF: predicated region fallthrough
CT: control target
= control target key end

     0   :  { %8 = vsyncpa [#allocation4], 0  ;;  %s1631_s0 = inlined_call_operand.hbm [shape: f32[512,128], index: 0, kind: input, shape index: {}]   ;;  %s1632_s1 = inlined_call_operand.hbm [shape: f32[128,128], index: 1, kind: input, shape index: {}]   ;;  %s1633_s2 = inlined_call_operand.vmem [shape: f32[1,128], index: 2, kind: input, shape index: {}]   ;;  %s1634_s3 = inlined_call_operand.hbm [shape: f32[512,128], index: 3, kind: output, shape index: {}]  }
   0x1   :  { %10 = vsyncpa [#allocation4 + $0x1], 0 }
   0x2   :  { %11 = vsyncpa [#allocation7], 0 }
   0x3   :  { %12 = vsyncpa [#allocation5], 0 }
   0x4   :  { %14 = vsyncpa [#allocation5 + $0x1], 0  ;;  %s1296_s12 = smov 0   ;;  %s1298_s13 = smov 0  }
   0x5   :  { %s1300_s14 = smov 0   ;;  %s1302_s15 = smov 0  }
   0x6   :  { %s1304_s16 = smov 0   ;;  %s1306_s17 = smov 0  }
   0x7 LB: > { %s850_s18 = sadd.s32 4294967295, %s1267_s17   ;;  %s851_s19 = sadd.s32 4294967294, %s1267_s17   ;;  %s1267_s17 = sphi %s1306_s17, %s20_s17   ;;  %s1263_s16 = sphi %s1304_s16, %s1658_s16   ;;  %s1259_s15 = sphi %s1302_s15, %s1657_s15   ;;  %s1255_s14 = sphi %s1300_s14, %s1656_s14   ;;  %s1251_s13 = sphi %s1298_s13, %s1655_s13   ;;  %s1247_s12 = sphi %s1296_s12, %s1654_s12  }
   0x8   : > { %p54_p0 = scmp.ne.s32.totalorder %s1251_s13, %s1247_s12  ;;  %p1330_p1 = scmp.eq.s32.totalorder %s850_s18, 0 }
   0x9   : > { %p1334_p2 = scmp.eq.s32.totalorder %s850_s18, 1  ;;  %p131_p3 = scmp.eq.s32.totalorder %s851_s19, 1 }
   0xa   : > { %s1639_s20 = scalar_select %p1330_p1, 1, 0 }
   0xb   : > { %s1640_s21 = scalar_select %p1334_p2, 1, 0 }
   0xc   : > { %p1340_p4 = por %p1330_p1, %p54_p0  ;;  %p852_p5 = scmp.ge.s32.totalorder %s1267_s17, 1 }
   0xd   : > { %p1345_p6 = por %p131_p3, %p54_p0  ;;  %p138_p7 = scmp.lt.s32.totalorder %s1267_s17, 3 }
   0xe   : > { %s1641_s22 = scalar_select %p1340_p4, 1, 0 }
   0xf   : > { %s1642_s23 = scalar_select %p1345_p6, 1, 0 }
  0x10   : > { %p1350_p8 = pnand %p852_p5, %p138_p7  ;;  %s1269_s25 = smov [#allocation6]  }
  0x11   : > { %s153_s26 = sshll.u32 %s1269_s25, 4  ;;  %s32_s28 = sadd.s32 1, %s1263_s16  ;;  %s154_s26 = int_to_ptr.vmem [resolvable:$true] %s153_s26 }
  0x12   : > { %s1643_s24 = scalar_select %p1350_p8, 1, 0 }
  0x13   : > { %p1054_p9 = pneg %p1350_p8  ;;  %s1123_s4 = scalar_lea.hbm %s1632_s1, 2048 }
  0x14   : > { %p1124_p12 = scmp.ne.s32.totalorder %s1632_s1, %s1123_s4  ;;  %p1130_p5 = scmp.lt.u32.totalorder %s1123_s4, %s1632_s1 }
  0x15   : > { %p1359_p11 = pnand %p1054_p9, %p1330_p1 }
  0x17   : > { %p1125_p13 = pneg %p1359_p11 }
  0x19   : > { %p1126_p0 = pnand %p1125_p13, %p1124_p12 }
  0x1b   : > { %p1127_p3 = pneg %p1126_p0 }
  0x1d   : > { %p1132_p7 = pnand %p1130_p5, %p1127_p3 }
  0x1f   : > { %1135 = shalt.err (!%p1132_p7)
}
  0x20   : > { %s1136_s9 = scalar_lea.vmem %s154_s26, 2048  ;;  %p1144_p1 = scmp.lt.s32.totalorder %s154_s26, %s154_s26 }
  0x21   : > { %p1137_p9 = scmp.ne.s32.totalorder %s154_s26, %s1136_s9  ;;  %p1145_p4 = scmp.lt.s32.totalorder %s1136_s9, %s1136_s9 }
  0x23   : > { %p1139_p10 = pnand %p1137_p9, %p1125_p13  ;;  %p1146_p8 = por %p1145_p4, %p1144_p1 }
  0x25   : > { %p1140_p6 = pneg %p1139_p10 }
  0x27   : > { %p1147_p2 = pnand %p1146_p8, %p1140_p6 }
  0x29   : > { %1150 = shalt.err (!%p1147_p2)
}
  0x2a   : > { %s1270_s10 = smov 128   ;;  %s1271_s11 = smov 8  }
  0x2b   : > { %1057 = dma.hbm_to_vmem [thread:$0]  (!%p1359_p11), %s1632_s1, 2048, %s154_s26, [#allocation7], %s1270_s10, %s1270_s10, %s1271_s11  }
  0x2c   : > { %p34_p1 = scmp.ge.s32.totalorder %s32_s28, 2  ;;  %s41_s25 = sadd.s32 1, %s1255_s14 }
  0x2d   : > { %p48_p2 = scmp.ne.s32.totalorder %s1255_s14, %s1251_s13  ;;  %p49_p4 = scmp.eq.s32.totalorder %s1267_s17, 0 }
  0x2e   : > { %s1660_s28 = smov (%p34_p1, %s32_s28), 0  ;;  %p1646_p8 = scmp.ne.s32.totalorder %s1640_s21, 0 }
  0x2f   : > { %p1389_p6 = por %p49_p4, %p48_p2  ;;  %s36_s30 = ssub.s32 %s1263_s16, %s1660_s28 }
  0x30   : > { %p1395_p10 = por %p1646_p8, %p48_p2  ;;  %p1067_p12 = scmp.lt.s32.totalorder %s1267_s17, 2 }
  0x31   : > { %p39_p11 = scmp.eq.s32.totalorder %s36_s30, 0  ;;  %s170_s26 = sand.u32 1, %s1255_s14  }
  0x32   : > { %s855_s4 = sshll.u32 %s170_s26, 8  ;;  %s868_s6 = sshll.u32 %s1263_s16, 12 }
  0x33   : > { %s1404_s5 = scalar_select %p39_p11, %s1255_s14, %s41_s25  }
  0x34   : > { %s1410_s9 = scalar_lea.hbm %s1631_s0, %s868_s6  ;;  %s174_s21 = scalar_lea.vmem [#allocation3], %s855_s4 }
  0x35   : > { %s182_s18 = sshll.u32 %s174_s21, 4  ;;  %p1416_p13 = pnand %p1067_p12, %p1389_p6  ;;  %s1412_s18 = int_to_ptr.vmem [resolvable:$true] %s182_s18 }
  0x36   : > { %s1420_s25 = scalar_lea.sflag [#allocation4], %s170_s26  ;;  %s1151_s30 = scalar_lea.hbm %s1410_s9, 4096 }
  0x37   : > { %p1152_p0 = scmp.ne.s32.totalorder %s1410_s9, %s1151_s30  ;;  %p1153_p3 = pneg %p1416_p13 }
  0x38   : > { %s1156_s29 = scalar_lea.hbm %s1631_s0, 8192  ;;  %p1157_p9 = scmp.lt.u32.totalorder %s1410_s9, %s1631_s0 }
  0x39   : > { %p1154_p5 = pnand %p1153_p3, %p1152_p0  ;;  %p1158_p1 = scmp.lt.u32.totalorder %s1156_s29, %s1151_s30 }
  0x3a   : > { %p1160_p4 = scmp.lt.u32.totalorder %s1151_s30, %s1410_s9 }
  0x3b   : > { %p1155_p7 = pneg %p1154_p5  ;;  %p1159_p2 = por %p1158_p1, %p1157_p9 }
  0x3d   : > { %p1161_p6 = por %p1160_p4, %p1159_p2 }
  0x3f   : > { %p1162_p8 = pnand %p1161_p6, %p1155_p7 }
  0x41   : > { %1165 = shalt.err (!%p1162_p8)
}
  0x42   : > { %s1166_s26 = scalar_lea.vmem %s1412_s18, 4096  ;;  %s1272_s21 = smov [#allocation3]  }
  0x43   : > { %p1167_p12 = scmp.ne.s32.totalorder %s1412_s18, %s1166_s26  ;;  %s1171_s4 = sshll.u32 %s1272_s21, 4  ;;  %s1172_s4 = int_to_ptr.vmem [resolvable:$false] %s1171_s4 }
  0x44   : > { %s1173_s6 = scalar_lea.vmem %s1172_s4, 8192  ;;  %p1174_p5 = scmp.lt.s32.totalorder %s1412_s18, %s1172_s4 }
  0x45   : > { %p1169_p11 = pnand %p1167_p12, %p1153_p3  ;;  %p1175_p9 = scmp.lt.s32.totalorder %s1173_s6, %s1166_s26 }
  0x47   : > { %p1170_p0 = pneg %p1169_p11  ;;  %p1176_p1 = por %p1175_p9, %p1174_p5 }
  0x49   : > { %p1177_p2 = pnand %p1176_p1, %p1170_p0 }
  0x4b   : > { %1180 = shalt.err (!%p1177_p2)
}
  0x4c   : > { %1061 = dma.hbm_to_vmem [thread:$0]  (!%p1416_p13), %s1410_s9, 4096, %s1412_s18, %s1420_s25, %s1270_s10, %s1270_s10, %s1271_s11  }
  0x4d   : > { %p1649_p3 = scmp.ne.s32.totalorder %s1643_s24, 0 }
  0x4e   : > { %s1454_s30 = sand.u32 (!%p1649_p3), 1, %s1251_s13   ;;  %p1650_p7 = scmp.ne.s32.totalorder (!%p1649_p3), %s1641_s22, 0 }
  0x4f   : > { %194 = sbr.rel (%p1649_p3) target bundleno = 383 (0x17f), region = 32  ;;  %s859_s29 = sshll.u32 (!%p1649_p3), %s1454_s30, 8 }
  0x50   : > { %s197_s7 = scalar_lea.sflag (!%p1649_p3), [#allocation4], %s1454_s30  ;;  %s1460_s19 = scalar_lea.vmem (!%p1649_p3), [#allocation3], %s859_s29 }
  0x56   : > { %1234 = dma.done.wait (%p1650_p7), %s197_s7, 4096  }
  0x57   : > { %1236 = vsyncadd (%p1650_p7), %s197_s7, 4294963200  ;;  %p1651_p13 = scmp.ne.s32.totalorder %s1639_s20, 0 }
  0x59   : > { %1238 = dma.done.wait (%p1651_p13), [#allocation7], 2048  }
  0x5a   : > { %1240 = vsyncadd (%p1651_p13), [#allocation7], 4294965248  ;;  %v330_v0 = vld [vmem:[#allocation6] sm:$0xff]  ;;  %v331_v1 = vld [vmem:[#allocation6 + $0x8] sm:$0xff]  ;;  %s1513_s24 = scalar_lea.vmem [#allocation8], %s859_s29  ;;  %s869_s10 = sshll.u32 %s1259_s15, 12 }
  0x5b   : > { %v332_v2 = vld [vmem:[#allocation6 + $0x10] sm:$0xff]  ;;  %v998_v3 = vpack.c.bf16 %v331_v1, %v330_v0  ;;  %v333_v4 = vld [vmem:[#allocation6 + $0x18] sm:$0xff]  ;;  %v334_v6 = vld [vmem:[#allocation6 + $0x20] sm:$0xff]  ;;  %s755_s11 = sshll.u32 %s1513_s24, 4  ;;  %s1574_s18 = scalar_lea.hbm %s1634_s3, %s869_s10  ;;  %s1576_s11 = int_to_ptr.vmem [resolvable:$true] %s755_s11 }
  0x5c   : > { %v1002_v5 = vpack.c.bf16 %v333_v4, %v332_v2  ;;  %v335_v7 = vld [vmem:[#allocation6 + $0x28] sm:$0xff]  ;;  %v298_v9 = vld [vmem:[%s1460_s19] sm:$0xff]  ;;  %v336_v11 = vld [vmem:[#allocation6 + $0x30] sm:$0xff]  ;;  %s742_s25 = scalar_lea.sflag [#allocation5], %s1454_s30  ;;  %s1181_s8 = scalar_lea.vmem %s1576_s11, 4096 }
  0x5d   : > { %999 = vmatprep.subr.bf16.mxu0 %v998_v3  ;;  %1030 = vmatprep.subr.bf16.mxu1 %v998_v3  ;;  %v1006_v8 = vpack.c.bf16 %v335_v7, %v334_v6  ;;  %v314_v10 = vld [vmem:[%s1460_s19 + $0x80] sm:$0xff]  ;;  %v337_v12 = vld [vmem:[#allocation6 + $0x38] sm:$0xff]  ;;  %v339_v15 = vld [vmem:[#allocation6 + $0x48] sm:$0xff]  ;;  %p1182_p4 = scmp.ne.s32.totalorder %s1576_s11, %s1181_s8  ;;  %s1273_s26 = smov [#allocation8]  }
  0x5e   : > { %1001 = vmatpush3.bf16.msra.mxu0 %v998_v3  ;;  %1038 = vmatpush3.bf16.msra.mxu1 %v998_v3  ;;  %v1010_v13 = vpack.c.bf16 %v337_v12, %v336_v11  ;;  %v338_v14 = vld [vmem:[#allocation6 + $0x40] sm:$0xff]  ;;  %v340_v17 = vld [vmem:[#allocation6 + $0x50] sm:$0xff]  ;;  %v341_v18 = vld [vmem:[#allocation6 + $0x58] sm:$0xff]  ;;  %s1185_s21 = sshll.u32 %s1273_s26, 4  ;;  %s1186_s21 = int_to_ptr.vmem [resolvable:$false] %s1185_s21 }
  0x5f   : > { %1003 = vmatprep.subr.bf16.mxu0 %v1002_v5  ;;  %1031 = vmatprep.subr.bf16.mxu1 %v1002_v5  ;;  %v1014_v16 = vpack.c.bf16 %v339_v15, %v338_v14  ;;  %v1018_v19 = vpack.c.bf16 %v341_v18, %v340_v17  ;;  %v342_v20 = vld [vmem:[#allocation6 + $0x60] sm:$0xff]  ;;  %v343_v21 = vld [vmem:[#allocation6 + $0x68] sm:$0xff]  ;;  %v344_v23 = vld [vmem:[#allocation6 + $0x70] sm:$0xff]  ;;  %p1183_p6 = pnand %p1182_p4, %p1395_p10  ;;  %s1187_s4 = scalar_lea.vmem %s1186_s21, 8192 }
  0x60   : > { %950 = vmatprep.mubr.f32.mxu0 %v298_v9  ;;  %974 = vmatprep.mubr.f32.mxu1 %v314_v10  ;;  %v1022_v22 = vpack.c.bf16 %v343_v21, %v342_v20  ;;  %v345_v24 = vld [vmem:[#allocation6 + $0x78] sm:$0xff]  ;;  %v299_v26 = vld [vmem:[%s1460_s19 + $0x8] sm:$0xff]  ;;  %v300_v28 = vld [vmem:[%s1460_s19 + $0x10] sm:$0xff]  ;;  %p1188_p12 = scmp.lt.s32.totalorder %s1576_s11, %s1186_s21  ;;  %p1189_p11 = scmp.lt.s32.totalorder %s1187_s4, %s1181_s8 }
  0x61   : > { %v1026_v25 = vpack.c.bf16 %v345_v24, %v344_v23  ;;  %v315_v27 = vld [vmem:[%s1460_s19 + $0x88] sm:$0xff]  ;;  %v316_v29 = vld [vmem:[%s1460_s19 + $0x90] sm:$0xff]  ;;  %v301_v30 = vld [vmem:[%s1460_s19 + $0x18] sm:$0xff]  ;;  %p1184_p8 = pneg %p1183_p6 }
  0x62   : > { %1005 = vmatpush3.bf16.msra.mxu0 %v1002_v5  ;;  %1039 = vmatpush3.bf16.msra.mxu1 %v1002_v5  ;;  %v317_v31 = vld [vmem:[%s1460_s19 + $0x98] sm:$0xff]  ;;  %v302_v32 = vld [vmem:[%s1460_s19 + $0x20] sm:$0xff]  ;;  %v303_v34 = vld [vmem:[%s1460_s19 + $0x28] sm:$0xff]  ;;  %p1190_p0 = por %p1189_p11, %p1188_p12 }
  0x63   : > { %1007 = vmatprep.subr.bf16.mxu0 %v1006_v8  ;;  %1032 = vmatprep.subr.bf16.mxu1 %v1006_v8  ;;  %v318_v33 = vld [vmem:[%s1460_s19 + $0xa0] sm:$0xff]  ;;  %v319_v35 = vld [vmem:[%s1460_s19 + $0xa8] sm:$0xff]  ;;  %v304_v36 = vld [vmem:[%s1460_s19 + $0x30] sm:$0xff] }
  0x64   : > { %v320_v37 = vld [vmem:[%s1460_s19 + $0xb0] sm:$0xff]  ;;  %v305_v38 = vld [vmem:[%s1460_s19 + $0x38] sm:$0xff]  ;;  %v306_v40 = vld [vmem:[%s1460_s19 + $0x40] sm:$0xff]  ;;  %p1191_p5 = pnand %p1190_p0, %p1184_p8 }
  0x65   : > { %v321_v39 = vld [vmem:[%s1460_s19 + $0xb8] sm:$0xff]  ;;  %v322_v41 = vld [vmem:[%s1460_s19 + $0xc0] sm:$0xff]  ;;  %v307_v42 = vld [vmem:[%s1460_s19 + $0x48] sm:$0xff] }
  0x66   : > { %1009 = vmatpush3.bf16.msra.mxu0 %v1006_v8  ;;  %1040 = vmatpush3.bf16.msra.mxu1 %v1006_v8  ;;  %v323_v43 = vld [vmem:[%s1460_s19 + $0xc8] sm:$0xff]  ;;  %v308_v44 = vld [vmem:[%s1460_s19 + $0x50] sm:$0xff]  ;;  %v309_v46 = vld [vmem:[%s1460_s19 + $0x58] sm:$0xff] }
  0x67   : > { %1011 = vmatprep.subr.bf16.mxu0 %v1010_v13  ;;  %1033 = vmatprep.subr.bf16.mxu1 %v1010_v13  ;;  %v324_v45 = vld [vmem:[%s1460_s19 + $0xd0] sm:$0xff]  ;;  %v325_v47 = vld [vmem:[%s1460_s19 + $0xd8] sm:$0xff]  ;;  %v310_v48 = vld [vmem:[%s1460_s19 + $0x60] sm:$0xff] }
  0x68   : > { %v326_v49 = vld [vmem:[%s1460_s19 + $0xe0] sm:$0xff]  ;;  %v311_v50 = vld [vmem:[%s1460_s19 + $0x68] sm:$0xff]  ;;  %v312_v52 = vld [vmem:[%s1460_s19 + $0x70] sm:$0xff] }
  0x69   : > { %v327_v51 = vld [vmem:[%s1460_s19 + $0xe8] sm:$0xff]  ;;  %v328_v53 = vld [vmem:[%s1460_s19 + $0xf0] sm:$0xff]  ;;  %v313_v54 = vld [vmem:[%s1460_s19 + $0x78] sm:$0xff] }
  0x6a   : > { %1013 = vmatpush3.bf16.msra.mxu0 %v1010_v13  ;;  %1041 = vmatpush3.bf16.msra.mxu1 %v1010_v13  ;;  %v329_v55 = vld [vmem:[%s1460_s19 + $0xf8] sm:$0xff]  ;;  %v1505_v56 = vld [vmem:[%s1633_s2] ss:$0 sm:$0xff] }
  0x6b   : > { %1015 = vmatprep.subr.bf16.mxu0 %v1014_v16  ;;  %1034 = vmatprep.subr.bf16.mxu1 %v1014_v16 }
  0x6e   : > { %1017 = vmatpush3.bf16.msra.mxu0 %v1014_v16  ;;  %1042 = vmatpush3.bf16.msra.mxu1 %v1014_v16 }
  0x6f   : > { %1019 = vmatprep.subr.bf16.mxu0 %v1018_v19  ;;  %1035 = vmatprep.subr.bf16.mxu1 %v1018_v19 }
  0x72   : > { %1021 = vmatpush3.bf16.msra.mxu0 %v1018_v19  ;;  %1043 = vmatpush3.bf16.msra.mxu1 %v1018_v19 }
  0x73   : > { %1023 = vmatprep.subr.bf16.mxu0 %v1022_v22  ;;  %1036 = vmatprep.subr.bf16.mxu1 %v1022_v22 }
  0x76   : > { %1025 = vmatpush3.bf16.msra.mxu0 %v1022_v22  ;;  %1044 = vmatpush3.bf16.msra.mxu1 %v1022_v22 }
  0x77   : > { %1027 = vmatprep.subr.bf16.mxu0 %v1026_v25  ;;  %1037 = vmatprep.subr.bf16.mxu1 %v1026_v25 }
  0x7a   : > { %1029 = vmatpush3.bf16.msra.mxu0 %v1026_v25  ;;  %1045 = vmatpush3.bf16.msra.mxu1 %v1026_v25 }
  0x7d   : > { %951 = vmatmul.mubr.f32.vlgmr.msra.gmra.mrb[0].mxu0 %v299_v26  ;;  %975 = vmatmul.mubr.f32.vlgmr.msra.gmra.mrb[0].mxu1 %v315_v27 }
  0x7e   : > { %953 = vmatprep.mubr.f32.mxu0 %v300_v28  ;;  %977 = vmatprep.mubr.f32.mxu1 %v316_v29 }
  0x81   : > { %954 = vmatmul.mubr.f32.gmra.mrb[2].mxu0 %v301_v30  ;;  %978 = vmatmul.mubr.f32.gmra.mrb[2].mxu1 %v317_v31 }
  0x82   : > { %956 = vmatprep.mubr.f32.mxu0 %v302_v32  ;;  %980 = vmatprep.mubr.f32.mxu1 %v318_v33 }
  0x85   : > { %957 = vmatmul.mubr.f32.gmra.mrb[4].mxu0 %v303_v34  ;;  %981 = vmatmul.mubr.f32.gmra.mrb[4].mxu1 %v319_v35 }
  0x86   : > { %959 = vmatprep.mubr.f32.mxu0 %v304_v36  ;;  %983 = vmatprep.mubr.f32.mxu1 %v320_v37 }
  0x89   : > { %960 = vmatmul.mubr.f32.gmra.mrb[6].mxu0 %v305_v38  ;;  %984 = vmatmul.mubr.f32.gmra.mrb[6].mxu1 %v321_v39 }
  0x8a   : > { %962 = vmatprep.mubr.f32.mxu0 %v306_v40  ;;  %986 = vmatprep.mubr.f32.mxu1 %v322_v41 }
  0x8d   : > { %963 = vmatmul.mubr.f32.gmra.mrb[8].mxu0 %v307_v42  ;;  %987 = vmatmul.mubr.f32.gmra.mrb[8].mxu1 %v323_v43 }
  0x8e   : > { %965 = vmatprep.mubr.f32.mxu0 %v308_v44  ;;  %989 = vmatprep.mubr.f32.mxu1 %v324_v45 }
  0x91   : > { %966 = vmatmul.mubr.f32.gmra.mrb[10].mxu0 %v309_v46  ;;  %990 = vmatmul.mubr.f32.gmra.mrb[10].mxu1 %v325_v47 }
  0x92   : > { %968 = vmatprep.mubr.f32.mxu0 %v310_v48  ;;  %992 = vmatprep.mubr.f32.mxu1 %v326_v49 }
  0x95   : > { %969 = vmatmul.mubr.f32.gmra.mrb[12].mxu0 %v311_v50  ;;  %993 = vmatmul.mubr.f32.gmra.mrb[12].mxu1 %v327_v51 }
  0x96   : > { %971 = vmatprep.mubr.f32.mxu0 %v312_v52  ;;  %995 = vmatprep.mubr.f32.mxu1 %v328_v53 }
  0x99   : > { %972 = vmatmul.mubr.f32.gmra.mrb[14].mxu0 %v313_v54  ;;  %996 = vmatmul.mubr.f32.gmra.mrb[14].mxu1 %v329_v55 }
 0x150   : > { %v952_v57 = vpop.f32.mrb[0].mxu0  ;;  %v976_v58 = vpop.f32.mrb[0].mxu1 }
 0x151   : > { %v678_v59 = vadd.f32 %v952_v57, %v1505_v56  ;;  %v694_v60 = vadd.f32 %v976_v58, %v1505_v56  ;;  %v412_v61 = vpop.f32.mrb[1].mxu0  ;;  %v492_v62 = vpop.f32.mrb[1].mxu1 }
 0x152   : > { %v677_v63 = vadd.f32 %v1505_v56, %v412_v61  ;;  %v693_v0 = vadd.f32 %v1505_v56, %v492_v62 }
 0x153   : > { %710 = vst [vmem:[%s1513_s24 + $0x8] sm:$0xff] %v678_v59  ;;  %726 = vst [vmem:[%s1513_s24 + $0x88] sm:$0xff] %v694_v60 }
 0x154   : > { %709 = vst [vmem:[%s1513_s24] sm:$0xff] %v677_v63  ;;  %725 = vst [vmem:[%s1513_s24 + $0x80] sm:$0xff] %v693_v0  ;;  %v955_v1 = vpop.f32.mrb[2].mxu0  ;;  %v979_v2 = vpop.f32.mrb[2].mxu1 }
 0x155   : > { %v680_v3 = vadd.f32 %v955_v1, %v1505_v56  ;;  %v696_v4 = vadd.f32 %v979_v2, %v1505_v56  ;;  %v422_v5 = vpop.f32.mrb[3].mxu0  ;;  %v502_v6 = vpop.f32.mrb[3].mxu1 }
 0x156   : > { %v679_v7 = vadd.f32 %v1505_v56, %v422_v5  ;;  %v695_v8 = vadd.f32 %v1505_v56, %v502_v6 }
 0x157   : > { %712 = vst [vmem:[%s1513_s24 + $0x18] sm:$0xff] %v680_v3  ;;  %728 = vst [vmem:[%s1513_s24 + $0x98] sm:$0xff] %v696_v4 }
 0x158   : > { %711 = vst [vmem:[%s1513_s24 + $0x10] sm:$0xff] %v679_v7  ;;  %727 = vst [vmem:[%s1513_s24 + $0x90] sm:$0xff] %v695_v8  ;;  %v958_v9 = vpop.f32.mrb[4].mxu0  ;;  %v982_v10 = vpop.f32.mrb[4].mxu1 }
 0x159   : > { %v682_v11 = vadd.f32 %v958_v9, %v1505_v56  ;;  %v698_v12 = vadd.f32 %v982_v10, %v1505_v56  ;;  %v432_v13 = vpop.f32.mrb[5].mxu0  ;;  %v512_v14 = vpop.f32.mrb[5].mxu1 }
 0x15a   : > { %v681_v15 = vadd.f32 %v1505_v56, %v432_v13  ;;  %v697_v16 = vadd.f32 %v1505_v56, %v512_v14 }
 0x15b   : > { %714 = vst [vmem:[%s1513_s24 + $0x28] sm:$0xff] %v682_v11  ;;  %730 = vst [vmem:[%s1513_s24 + $0xa8] sm:$0xff] %v698_v12 }
 0x15c   : > { %713 = vst [vmem:[%s1513_s24 + $0x20] sm:$0xff] %v681_v15  ;;  %729 = vst [vmem:[%s1513_s24 + $0xa0] sm:$0xff] %v697_v16  ;;  %v961_v17 = vpop.f32.mrb[6].mxu0  ;;  %v985_v18 = vpop.f32.mrb[6].mxu1 }
 0x15d   : > { %v684_v19 = vadd.f32 %v961_v17, %v1505_v56  ;;  %v700_v20 = vadd.f32 %v985_v18, %v1505_v56  ;;  %v442_v21 = vpop.f32.mrb[7].mxu0  ;;  %v522_v22 = vpop.f32.mrb[7].mxu1 }
 0x15e   : > { %v683_v23 = vadd.f32 %v1505_v56, %v442_v21  ;;  %v699_v24 = vadd.f32 %v1505_v56, %v522_v22 }
 0x15f   : > { %716 = vst [vmem:[%s1513_s24 + $0x38] sm:$0xff] %v684_v19  ;;  %732 = vst [vmem:[%s1513_s24 + $0xb8] sm:$0xff] %v700_v20 }
 0x160   : > { %715 = vst [vmem:[%s1513_s24 + $0x30] sm:$0xff] %v683_v23  ;;  %731 = vst [vmem:[%s1513_s24 + $0xb0] sm:$0xff] %v699_v24  ;;  %v964_v25 = vpop.f32.mrb[8].mxu0  ;;  %v988_v26 = vpop.f32.mrb[8].mxu1 }
 0x161   : > { %v686_v27 = vadd.f32 %v964_v25, %v1505_v56  ;;  %v702_v28 = vadd.f32 %v988_v26, %v1505_v56  ;;  %v452_v29 = vpop.f32.mrb[9].mxu0  ;;  %v532_v30 = vpop.f32.mrb[9].mxu1 }
 0x162   : > { %v685_v31 = vadd.f32 %v1505_v56, %v452_v29  ;;  %v701_v32 = vadd.f32 %v1505_v56, %v532_v30 }
 0x163   : > { %718 = vst [vmem:[%s1513_s24 + $0x48] sm:$0xff] %v686_v27  ;;  %734 = vst [vmem:[%s1513_s24 + $0xc8] sm:$0xff] %v702_v28 }
 0x164   : > { %717 = vst [vmem:[%s1513_s24 + $0x40] sm:$0xff] %v685_v31  ;;  %733 = vst [vmem:[%s1513_s24 + $0xc0] sm:$0xff] %v701_v32  ;;  %v967_v33 = vpop.f32.mrb[10].mxu0  ;;  %v991_v34 = vpop.f32.mrb[10].mxu1 }
 0x165   : > { %v688_v35 = vadd.f32 %v967_v33, %v1505_v56  ;;  %v704_v36 = vadd.f32 %v991_v34, %v1505_v56  ;;  %v462_v37 = vpop.f32.mrb[11].mxu0  ;;  %v542_v38 = vpop.f32.mrb[11].mxu1 }
 0x166   : > { %v687_v39 = vadd.f32 %v1505_v56, %v462_v37  ;;  %v703_v40 = vadd.f32 %v1505_v56, %v542_v38 }
 0x167   : > { %720 = vst [vmem:[%s1513_s24 + $0x58] sm:$0xff] %v688_v35  ;;  %736 = vst [vmem:[%s1513_s24 + $0xd8] sm:$0xff] %v704_v36 }
 0x168   : > { %719 = vst [vmem:[%s1513_s24 + $0x50] sm:$0xff] %v687_v39  ;;  %735 = vst [vmem:[%s1513_s24 + $0xd0] sm:$0xff] %v703_v40  ;;  %v970_v41 = vpop.f32.mrb[12].mxu0  ;;  %v994_v42 = vpop.f32.mrb[12].mxu1 }
 0x169   : > { %v690_v43 = vadd.f32 %v970_v41, %v1505_v56  ;;  %v706_v44 = vadd.f32 %v994_v42, %v1505_v56  ;;  %v472_v45 = vpop.f32.mrb[13].mxu0  ;;  %v552_v46 = vpop.f32.mrb[13].mxu1 }
 0x16a   : > { %v689_v47 = vadd.f32 %v1505_v56, %v472_v45  ;;  %v705_v48 = vadd.f32 %v1505_v56, %v552_v46 }
 0x16b   : > { %722 = vst [vmem:[%s1513_s24 + $0x68] sm:$0xff] %v690_v43  ;;  %738 = vst [vmem:[%s1513_s24 + $0xe8] sm:$0xff] %v706_v44 }
 0x16c   : > { %721 = vst [vmem:[%s1513_s24 + $0x60] sm:$0xff] %v689_v47  ;;  %737 = vst [vmem:[%s1513_s24 + $0xe0] sm:$0xff] %v705_v48  ;;  %v973_v49 = vpop.f32.mrb[14].mxu0  ;;  %v997_v50 = vpop.f32.mrb[14].mxu1 }
 0x16d   : > { %v692_v51 = vadd.f32 %v973_v49, %v1505_v56  ;;  %v708_v52 = vadd.f32 %v997_v50, %v1505_v56  ;;  %v482_v53 = vpop.f32.mrb[15].mxu0  ;;  %v562_v54 = vpop.f32.mrb[15].mxu1 }
 0x16e   : > { %v691_v55 = vadd.f32 %v1505_v56, %v482_v53  ;;  %v707_v57 = vadd.f32 %v1505_v56, %v562_v54 }
 0x16f   : > { %724 = vst [vmem:[%s1513_s24 + $0x78] sm:$0xff] %v692_v51  ;;  %740 = vst [vmem:[%s1513_s24 + $0xf8] sm:$0xff] %v708_v52 }
 0x170   : > { %723 = vst [vmem:[%s1513_s24 + $0x70] sm:$0xff] %v691_v55  ;;  %739 = vst [vmem:[%s1513_s24 + $0xf0] sm:$0xff] %v707_v57 }
 0x171   : > { %1194 = shalt.err (!%p1191_p5)
}
 0x172   : > { %s1195_s6 = scalar_lea.hbm %s1574_s18, 4096  ;;  %s1199_s19 = scalar_lea.hbm %s1634_s3, 8192 }
 0x173   : > { %p1196_p9 = scmp.ne.s32.totalorder %s1574_s18, %s1195_s6  ;;  %p1200_p3 = scmp.lt.u32.totalorder %s1574_s18, %s1634_s3 }
 0x174   : > { %p1201_p7 = scmp.lt.u32.totalorder %s1199_s19, %s1195_s6  ;;  %p1203_p4 = scmp.lt.u32.totalorder %s1195_s6, %s1574_s18 }
 0x175   : > { %p1197_p1 = pnand %p1196_p9, %p1395_p10 }
 0x176   : > { %p1202_p13 = por %p1201_p7, %p1200_p3 }
 0x177   : > { %p1198_p2 = pneg %p1197_p1 }
 0x178   : > { %p1204_p6 = por %p1203_p4, %p1202_p13 }
 0x17a   : > { %p1205_p8 = pnand %p1204_p6, %p1198_p2 }
 0x17c   : > { %1208 = shalt.err (!%p1205_p8)
}
 0x17d   : > { %s1274_s24 = smov 128   ;;  %s1275_s10 = smov 8  }
 0x17e   : > { %1052 = dma.vmem_to_hbm [thread:$0]  (%p1395_p10), %s1576_s11, 4096, %s1574_s18, %s742_s25, %s1274_s24, %s1274_s24, %s1275_s10  }
 0x17f PF: > { %s770_s15 = sand.u32 1, %s1247_s12   ;;  %p1652_p12 = scmp.ne.s32.totalorder %s1642_s23, 0 }
 0x180   : > { %p1653_p11 = scmp.ge.s32.totalorder %s1267_s17, 2  ;;  %s771_s9 = scalar_lea.sflag [#allocation5], %s770_s15 }
 0x182   : > { %p1063_p0 = pnand %p1653_p11, %p1652_p12 }
 0x184   : > { %1242 = dma.done.wait (!%p1063_p0), %s771_s9, 4096  }
 0x185   : > { %1244 = vsyncadd (!%p1063_p0), %s771_s9, 4294963200  ;;  %s20_s17 = sadd.s32 1, %s1267_s17   ;;  %s1654_s12 = smov %s1251_s13 }
 0x186   : > { %p17_p5 = scmp.ge.s32.totalorder %s20_s17, 4   ;;  %s1655_s13 = smov %s1255_s14 }
 0x187   : > { %s1656_s14 = smov %s1404_s5  ;;  %s1657_s15 = smov %s1263_s16 }
 0x188   : > { %s1658_s16 = smov %s1660_s28  ;;  %19 = sbr.rel (!%p17_p5) target bundleno = 7 (0x7), region = 90 }
 0x18f   :  { %776 = vsyncpa [#allocation4], 1 }
 0x190   :  { %778 = vsyncpa [#allocation4 + $0x1], 1 }
 0x191   :  { %779 = vsyncpa [#allocation7], 1 }
 0x192   :  { %780 = vsyncpa [#allocation5], 1 }
 0x193   :  { %782 = vsyncpa [#allocation5 + $0x1], 1 }

// kernel: tpu_custom_call.1
= control target key start
LH: loop header
LB: loop body
LE: loop exit
PB: predicated region body
PF: predicated region fallthrough
CT: control target
= control target key end

     0   :  { %8 = vsyncpa [#allocation4], 0  ;;  %s1631_s0 = inlined_call_operand.hbm [shape: f32[512,128], index: 0, kind: input, shape index: {}]   ;;  %s1632_s1 = inlined_call_operand.hbm [shape: f32[128,128], index: 1, kind: input, shape index: {}]   ;;  %s1633_s2 = inlined_call_operand.vmem [shape: f32[1,128], index: 2, kind: input, shape index: {}]   ;;  %s1634_s3 = inlined_call_operand.hbm [shape: f32[512,128], index: 3, kind: output, shape index: {}]  }
   0x1   :  { %10 = vsyncpa [#allocation4 + $0x1], 0 }
   0x2   :  { %11 = vsyncpa [#allocation7], 0 }
   0x3   :  { %12 = vsyncpa [#allocation5], 0 }
   0x4   :  { %14 = vsyncpa [#allocation5 + $0x1], 0  ;;  %s1296_s12 = smov 0   ;;  %s1298_s13 = smov 0  }
   0x5   :  { %s1300_s14 = smov 0   ;;  %s1302_s15 = smov 0  }
   0x6   :  { %s1304_s16 = smov 0   ;;  %s1306_s17 = smov 0  }
   0x7 LB: > { %s850_s18 = sadd.s32 4294967295, %s1267_s17   ;;  %s851_s19 = sadd.s32 4294967294, %s1267_s17   ;;  %s1267_s17 = sphi %s1306_s17, %s20_s17   ;;  %s1263_s16 = sphi %s1304_s16, %s1658_s16   ;;  %s1259_s15 = sphi %s1302_s15, %s1657_s15   ;;  %s1255_s14 = sphi %s1300_s14, %s1656_s14   ;;  %s1251_s13 = sphi %s1298_s13, %s1655_s13   ;;  %s1247_s12 = sphi %s1296_s12, %s1654_s12  }
   0x8   : > { %p54_p0 = scmp.ne.s32.totalorder %s1251_s13, %s1247_s12  ;;  %p1330_p1 = scmp.eq.s32.totalorder %s850_s18, 0 }
   0x9   : > { %p1334_p2 = scmp.eq.s32.totalorder %s850_s18, 1  ;;  %p131_p3 = scmp.eq.s32.totalorder %s851_s19, 1 }
   0xa   : > { %s1639_s20 = scalar_select %p1330_p1, 1, 0 }
   0xb   : > { %s1640_s21 = scalar_select %p1334_p2, 1, 0 }
   0xc   : > { %p1340_p4 = por %p1330_p1, %p54_p0  ;;  %p852_p5 = scmp.ge.s32.totalorder %s1267_s17, 1 }
   0xd   : > { %p1345_p6 = por %p131_p3, %p54_p0  ;;  %p138_p7 = scmp.lt.s32.totalorder %s1267_s17, 3 }
   0xe   : > { %s1641_s22 = scalar_select %p1340_p4, 1, 0 }
   0xf   : > { %s1642_s23 = scalar_select %p1345_p6, 1, 0 }
  0x10   : > { %p1350_p8 = pnand %p852_p5, %p138_p7  ;;  %s1269_s25 = smov [#allocation6]  }
  0x11   : > { %s153_s26 = sshll.u32 %s1269_s25, 4  ;;  %s32_s28 = sadd.s32 1, %s1263_s16  ;;  %s154_s26 = int_to_ptr.vmem [resolvable:$true] %s153_s26 }
  0x12   : > { %s1643_s24 = scalar_select %p1350_p8, 1, 0 }
  0x13   : > { %p1054_p9 = pneg %p1350_p8  ;;  %s1123_s4 = scalar_lea.hbm %s1632_s1, 2048 }
  0x14   : > { %p1124_p12 = scmp.ne.s32.totalorder %s1632_s1, %s1123_s4  ;;  %p1130_p5 = scmp.lt.u32.totalorder %s1123_s4, %s1632_s1 }
  0x15   : > { %p1359_p11 = pnand %p1054_p9, %p1330_p1 }
  0x17   : > { %p1125_p13 = pneg %p1359_p11 }
  0x19   : > { %p1126_p0 = pnand %p1125_p13, %p1124_p12 }
  0x1b   : > { %p1127_p3 = pneg %p1126_p0 }
  0x1d   : > { %p1132_p7 = pnand %p1130_p5, %p1127_p3 }
  0x1f   : > { %1135 = shalt.err (!%p1132_p7)
}
  0x20   : > { %s1136_s9 = scalar_lea.vmem %s154_s26, 2048  ;;  %p1144_p1 = scmp.lt.s32.totalorder %s154_s26, %s154_s26 }
  0x21   : > { %p1137_p9 = scmp.ne.s32.totalorder %s154_s26, %s1136_s9  ;;  %p1145_p4 = scmp.lt.s32.totalorder %s1136_s9, %s1136_s9 }
  0x23   : > { %p1139_p10 = pnand %p1137_p9, %p1125_p13  ;;  %p1146_p8 = por %p1145_p4, %p1144_p1 }
  0x25   : > { %p1140_p6 = pneg %p1139_p10 }
  0x27   : > { %p1147_p2 = pnand %p1146_p8, %p1140_p6 }
  0x29   : > { %1150 = shalt.err (!%p1147_p2)
}
  0x2a   : > { %s1270_s10 = smov 128   ;;  %s1271_s11 = smov 8  }
  0x2b   : > { %1057 = dma.hbm_to_vmem [thread:$0]  (!%p1359_p11), %s1632_s1, 2048, %s154_s26, [#allocation7], %s1270_s10, %s1270_s10, %s1271_s11  }
  0x2c   : > { %p34_p1 = scmp.ge.s32.totalorder %s32_s28, 2  ;;  %s41_s25 = sadd.s32 1, %s1255_s14 }
  0x2d   : > { %p48_p2 = scmp.ne.s32.totalorder %s1255_s14, %s1251_s13  ;;  %p49_p4 = scmp.eq.s32.totalorder %s1267_s17, 0 }
  0x2e   : > { %s1660_s28 = smov (%p34_p1, %s32_s28), 0  ;;  %p1646_p8 = scmp.ne.s32.totalorder %s1640_s21, 0 }
  0x2f   : > { %p1389_p6 = por %p49_p4, %p48_p2  ;;  %s36_s30 = ssub.s32 %s1263_s16, %s1660_s28 }
  0x30   : > { %p1395_p10 = por %p1646_p8, %p48_p2  ;;  %p1067_p12 = scmp.lt.s32.totalorder %s1267_s17, 2 }
  0x31   : > { %p39_p11 = scmp.eq.s32.totalorder %s36_s30, 0  ;;  %s170_s26 = sand.u32 1, %s1255_s14  }
  0x32   : > { %s855_s4 = sshll.u32 %s170_s26, 8  ;;  %s868_s6 = sshll.u32 %s1263_s16, 12 }
  0x33   : > { %s1404_s5 = scalar_select %p39_p11, %s1255_s14, %s41_s25  }
  0x34   : > { %s1410_s9 = scalar_lea.hbm %s1631_s0, %s868_s6  ;;  %s174_s21 = scalar_lea.vmem [#allocation3], %s855_s4 }
  0x35   : > { %s182_s18 = sshll.u32 %s174_s21, 4  ;;  %p1416_p13 = pnand %p1067_p12, %p1389_p6  ;;  %s1412_s18 = int_to_ptr.vmem [resolvable:$true] %s182_s18 }
  0x36   : > { %s1420_s25 = scalar_lea.sflag [#allocation4], %s170_s26  ;;  %s1151_s30 = scalar_lea.hbm %s1410_s9, 4096 }
  0x37   : > { %p1152_p0 = scmp.ne.s32.totalorder %s1410_s9, %s1151_s30  ;;  %p1153_p3 = pneg %p1416_p13 }
  0x38   : > { %s1156_s29 = scalar_lea.hbm %s1631_s0, 8192  ;;  %p1157_p9 = scmp.lt.u32.totalorder %s1410_s9, %s1631_s0 }
  0x39   : > { %p1154_p5 = pnand %p1153_p3, %p1152_p0  ;;  %p1158_p1 = scmp.lt.u32.totalorder %s1156_s29, %s1151_s30 }
  0x3a   : > { %p1160_p4 = scmp.lt.u32.totalorder %s1151_s30, %s1410_s9 }
  0x3b   : > { %p1155_p7 = pneg %p1154_p5  ;;  %p1159_p2 = por %p1158_p1, %p1157_p9 }
  0x3d   : > { %p1161_p6 = por %p1160_p4, %p1159_p2 }
  0x3f   : > { %p1162_p8 = pnand %p1161_p6, %p1155_p7 }
  0x41   : > { %1165 = shalt.err (!%p1162_p8)
}
  0x42   : > { %s1166_s26 = scalar_lea.vmem %s1412_s18, 4096  ;;  %s1272_s21 = smov [#allocation3]  }
  0x43   : > { %p1167_p12 = scmp.ne.s32.totalorder %s1412_s18, %s1166_s26  ;;  %s1171_s4 = sshll.u32 %s1272_s21, 4  ;;  %s1172_s4 = int_to_ptr.vmem [resolvable:$false] %s1171_s4 }
  0x44   : > { %s1173_s6 = scalar_lea.vmem %s1172_s4, 8192  ;;  %p1174_p5 = scmp.lt.s32.totalorder %s1412_s18, %s1172_s4 }
  0x45   : > { %p1169_p11 = pnand %p1167_p12, %p1153_p3  ;;  %p1175_p9 = scmp.lt.s32.totalorder %s1173_s6, %s1166_s26 }
  0x47   : > { %p1170_p0 = pneg %p1169_p11  ;;  %p1176_p1 = por %p1175_p9, %p1174_p5 }
  0x49   : > { %p1177_p2 = pnand %p1176_p1, %p1170_p0 }
  0x4b   : > { %1180 = shalt.err (!%p1177_p2)
}
  0x4c   : > { %1061 = dma.hbm_to_vmem [thread:$0]  (!%p1416_p13), %s1410_s9, 4096, %s1412_s18, %s1420_s25, %s1270_s10, %s1270_s10, %s1271_s11  }
  0x4d   : > { %p1649_p3 = scmp.ne.s32.totalorder %s1643_s24, 0 }
  0x4e   : > { %s1454_s30 = sand.u32 (!%p1649_p3), 1, %s1251_s13   ;;  %p1650_p7 = scmp.ne.s32.totalorder (!%p1649_p3), %s1641_s22, 0 }
  0x4f   : > { %194 = sbr.rel (%p1649_p3) target bundleno = 383 (0x17f), region = 32  ;;  %s859_s29 = sshll.u32 (!%p1649_p3), %s1454_s30, 8 }
  0x50   : > { %s197_s7 = scalar_lea.sflag (!%p1649_p3), [#allocation4], %s1454_s30  ;;  %s1460_s19 = scalar_lea.vmem (!%p1649_p3), [#allocation3], %s859_s29 }
  0x56   : > { %1234 = dma.done.wait (%p1650_p7), %s197_s7, 4096  }
  0x57   : > { %1236 = vsyncadd (%p1650_p7), %s197_s7, 4294963200  ;;  %p1651_p13 = scmp.ne.s32.totalorder %s1639_s20, 0 }
  0x59   : > { %1238 = dma.done.wait (%p1651_p13), [#allocation7], 2048  }
  0x5a   : > { %1240 = vsyncadd (%p1651_p13), [#allocation7], 4294965248  ;;  %v330_v0 = vld [vmem:[#allocation6] sm:$0xff]  ;;  %v331_v1 = vld [vmem:[#allocation6 + $0x8] sm:$0xff]  ;;  %s1513_s24 = scalar_lea.vmem [#allocation8], %s859_s29  ;;  %s869_s10 = sshll.u32 %s1259_s15, 12 }
  0x5b   : > { %v332_v2 = vld [vmem:[#allocation6 + $0x10] sm:$0xff]  ;;  %v998_v3 = vpack.c.bf16 %v331_v1, %v330_v0  ;;  %v333_v4 = vld [vmem:[#allocation6 + $0x18] sm:$0xff]  ;;  %v334_v6 = vld [vmem:[#allocation6 + $0x20] sm:$0xff]  ;;  %s755_s11 = sshll.u32 %s1513_s24, 4  ;;  %s1574_s18 = scalar_lea.hbm %s1634_s3, %s869_s10  ;;  %s1576_s11 = int_to_ptr.vmem [resolvable:$true] %s755_s11 }
  0x5c   : > { %v1002_v5 = vpack.c.bf16 %v333_v4, %v332_v2  ;;  %v335_v7 = vld [vmem:[#allocation6 + $0x28] sm:$0xff]  ;;  %v298_v9 = vld [vmem:[%s1460_s19] sm:$0xff]  ;;  %v336_v11 = vld [vmem:[#allocation6 + $0x30] sm:$0xff]  ;;  %s742_s25 = scalar_lea.sflag [#allocation5], %s1454_s30  ;;  %s1181_s8 = scalar_lea.vmem %s1576_s11, 4096 }
  0x5d   : > { %999 = vmatprep.subr.bf16.mxu0 %v998_v3  ;;  %1030 = vmatprep.subr.bf16.mxu1 %v998_v3  ;;  %v1006_v8 = vpack.c.bf16 %v335_v7, %v334_v6  ;;  %v314_v10 = vld [vmem:[%s1460_s19 + $0x80] sm:$0xff]  ;;  %v337_v12 = vld [vmem:[#allocation6 + $0x38] sm:$0xff]  ;;  %v339_v15 = vld [vmem:[#allocation6 + $0x48] sm:$0xff]  ;;  %p1182_p4 = scmp.ne.s32.totalorder %s1576_s11, %s1181_s8  ;;  %s1273_s26 = smov [#allocation8]  }
  0x5e   : > { %1001 = vmatpush3.bf16.msra.mxu0 %v998_v3  ;;  %1038 = vmatpush3.bf16.msra.mxu1 %v998_v3  ;;  %v1010_v13 = vpack.c.bf16 %v337_v12, %v336_v11  ;;  %v338_v14 = vld [vmem:[#allocation6 + $0x40] sm:$0xff]  ;;  %v340_v17 = vld [vmem:[#allocation6 + $0x50] sm:$0xff]  ;;  %v341_v18 = vld [vmem:[#allocation6 + $0x58] sm:$0xff]  ;;  %s1185_s21 = sshll.u32 %s1273_s26, 4  ;;  %s1186_s21 = int_to_ptr.vmem [resolvable:$false] %s1185_s21 }
  0x5f   : > { %1003 = vmatprep.subr.bf16.mxu0 %v1002_v5  ;;  %1031 = vmatprep.subr.bf16.mxu1 %v1002_v5  ;;  %v1014_v16 = vpack.c.bf16 %v339_v15, %v338_v14  ;;  %v1018_v19 = vpack.c.bf16 %v341_v18, %v340_v17  ;;  %v342_v20 = vld [vmem:[#allocation6 + $0x60] sm:$0xff]  ;;  %v343_v21 = vld [vmem:[#allocation6 + $0x68] sm:$0xff]  ;;  %v344_v23 = vld [vmem:[#allocation6 + $0x70] sm:$0xff]  ;;  %p1183_p6 = pnand %p1182_p4, %p1395_p10  ;;  %s1187_s4 = scalar_lea.vmem %s1186_s21, 8192 }
  0x60   : > { %950 = vmatprep.mubr.f32.mxu0 %v298_v9  ;;  %974 = vmatprep.mubr.f32.mxu1 %v314_v10  ;;  %v1022_v22 = vpack.c.bf16 %v343_v21, %v342_v20  ;;  %v345_v24 = vld [vmem:[#allocation6 + $0x78] sm:$0xff]  ;;  %v299_v26 = vld [vmem:[%s1460_s19 + $0x8] sm:$0xff]  ;;  %v300_v28 = vld [vmem:[%s1460_s19 + $0x10] sm:$0xff]  ;;  %p1188_p12 = scmp.lt.s32.totalorder %s1576_s11, %s1186_s21  ;;  %p1189_p11 = scmp.lt.s32.totalorder %s1187_s4, %s1181_s8 }
  0x61   : > { %v1026_v25 = vpack.c.bf16 %v345_v24, %v344_v23  ;;  %v315_v27 = vld [vmem:[%s1460_s19 + $0x88] sm:$0xff]  ;;  %v316_v29 = vld [vmem:[%s1460_s19 + $0x90] sm:$0xff]  ;;  %v301_v30 = vld [vmem:[%s1460_s19 + $0x18] sm:$0xff]  ;;  %p1184_p8 = pneg %p1183_p6 }
  0x62   : > { %1005 = vmatpush3.bf16.msra.mxu0 %v1002_v5  ;;  %1039 = vmatpush3.bf16.msra.mxu1 %v1002_v5  ;;  %v317_v31 = vld [vmem:[%s1460_s19 + $0x98] sm:$0xff]  ;;  %v302_v32 = vld [vmem:[%s1460_s19 + $0x20] sm:$0xff]  ;;  %v303_v34 = vld [vmem:[%s1460_s19 + $0x28] sm:$0xff]  ;;  %p1190_p0 = por %p1189_p11, %p1188_p12 }
  0x63   : > { %1007 = vmatprep.subr.bf16.mxu0 %v1006_v8  ;;  %1032 = vmatprep.subr.bf16.mxu1 %v1006_v8  ;;  %v318_v33 = vld [vmem:[%s1460_s19 + $0xa0] sm:$0xff]  ;;  %v319_v35 = vld [vmem:[%s1460_s19 + $0xa8] sm:$0xff]  ;;  %v304_v36 = vld [vmem:[%s1460_s19 + $0x30] sm:$0xff] }
  0x64   : > { %v320_v37 = vld [vmem:[%s1460_s19 + $0xb0] sm:$0xff]  ;;  %v305_v38 = vld [vmem:[%s1460_s19 + $0x38] sm:$0xff]  ;;  %v306_v40 = vld [vmem:[%s1460_s19 + $0x40] sm:$0xff]  ;;  %p1191_p5 = pnand %p1190_p0, %p1184_p8 }
  0x65   : > { %v321_v39 = vld [vmem:[%s1460_s19 + $0xb8] sm:$0xff]  ;;  %v322_v41 = vld [vmem:[%s1460_s19 + $0xc0] sm:$0xff]  ;;  %v307_v42 = vld [vmem:[%s1460_s19 + $0x48] sm:$0xff] }
  0x66   : > { %1009 = vmatpush3.bf16.msra.mxu0 %v1006_v8  ;;  %1040 = vmatpush3.bf16.msra.mxu1 %v1006_v8  ;;  %v323_v43 = vld [vmem:[%s1460_s19 + $0xc8] sm:$0xff]  ;;  %v308_v44 = vld [vmem:[%s1460_s19 + $0x50] sm:$0xff]  ;;  %v309_v46 = vld [vmem:[%s1460_s19 + $0x58] sm:$0xff] }
  0x67   : > { %1011 = vmatprep.subr.bf16.mxu0 %v1010_v13  ;;  %1033 = vmatprep.subr.bf16.mxu1 %v1010_v13  ;;  %v324_v45 = vld [vmem:[%s1460_s19 + $0xd0] sm:$0xff]  ;;  %v325_v47 = vld [vmem:[%s1460_s19 + $0xd8] sm:$0xff]  ;;  %v310_v48 = vld [vmem:[%s1460_s19 + $0x60] sm:$0xff] }
  0x68   : > { %v326_v49 = vld [vmem:[%s1460_s19 + $0xe0] sm:$0xff]  ;;  %v311_v50 = vld [vmem:[%s1460_s19 + $0x68] sm:$0xff]  ;;  %v312_v52 = vld [vmem:[%s1460_s19 + $0x70] sm:$0xff] }
  0x69   : > { %v327_v51 = vld [vmem:[%s1460_s19 + $0xe8] sm:$0xff]  ;;  %v328_v53 = vld [vmem:[%s1460_s19 + $0xf0] sm:$0xff]  ;;  %v313_v54 = vld [vmem:[%s1460_s19 + $0x78] sm:$0xff] }
  0x6a   : > { %1013 = vmatpush3.bf16.msra.mxu0 %v1010_v13  ;;  %1041 = vmatpush3.bf16.msra.mxu1 %v1010_v13  ;;  %v329_v55 = vld [vmem:[%s1460_s19 + $0xf8] sm:$0xff]  ;;  %v1505_v56 = vld [vmem:[%s1633_s2] ss:$0 sm:$0xff] }
  0x6b   : > { %1015 = vmatprep.subr.bf16.mxu0 %v1014_v16  ;;  %1034 = vmatprep.subr.bf16.mxu1 %v1014_v16 }
  0x6e   : > { %1017 = vmatpush3.bf16.msra.mxu0 %v1014_v16  ;;  %1042 = vmatpush3.bf16.msra.mxu1 %v1014_v16 }
  0x6f   : > { %1019 = vmatprep.subr.bf16.mxu0 %v1018_v19  ;;  %1035 = vmatprep.subr.bf16.mxu1 %v1018_v19 }
  0x72   : > { %1021 = vmatpush3.bf16.msra.mxu0 %v1018_v19  ;;  %1043 = vmatpush3.bf16.msra.mxu1 %v1018_v19 }
  0x73   : > { %1023 = vmatprep.subr.bf16.mxu0 %v1022_v22  ;;  %1036 = vmatprep.subr.bf16.mxu1 %v1022_v22 }
  0x76   : > { %1025 = vmatpush3.bf16.msra.mxu0 %v1022_v22  ;;  %1044 = vmatpush3.bf16.msra.mxu1 %v1022_v22 }
  0x77   : > { %1027 = vmatprep.subr.bf16.mxu0 %v1026_v25  ;;  %1037 = vmatprep.subr.bf16.mxu1 %v1026_v25 }
  0x7a   : > { %1029 = vmatpush3.bf16.msra.mxu0 %v1026_v25  ;;  %1045 = vmatpush3.bf16.msra.mxu1 %v1026_v25 }
  0x7d   : > { %951 = vmatmul.mubr.f32.vlgmr.msra.gmra.mrb[0].mxu0 %v299_v26  ;;  %975 = vmatmul.mubr.f32.vlgmr.msra.gmra.mrb[0].mxu1 %v315_v27 }
  0x7e   : > { %953 = vmatprep.mubr.f32.mxu0 %v300_v28  ;;  %977 = vmatprep.mubr.f32.mxu1 %v316_v29 }
  0x81   : > { %954 = vmatmul.mubr.f32.gmra.mrb[2].mxu0 %v301_v30  ;;  %978 = vmatmul.mubr.f32.gmra.mrb[2].mxu1 %v317_v31 }
  0x82   : > { %956 = vmatprep.mubr.f32.mxu0 %v302_v32  ;;  %980 = vmatprep.mubr.f32.mxu1 %v318_v33 }
  0x85   : > { %957 = vmatmul.mubr.f32.gmra.mrb[4].mxu0 %v303_v34  ;;  %981 = vmatmul.mubr.f32.gmra.mrb[4].mxu1 %v319_v35 }
  0x86   : > { %959 = vmatprep.mubr.f32.mxu0 %v304_v36  ;;  %983 = vmatprep.mubr.f32.mxu1 %v320_v37 }
  0x89   : > { %960 = vmatmul.mubr.f32.gmra.mrb[6].mxu0 %v305_v38  ;;  %984 = vmatmul.mubr.f32.gmra.mrb[6].mxu1 %v321_v39 }
  0x8a   : > { %962 = vmatprep.mubr.f32.mxu0 %v306_v40  ;;  %986 = vmatprep.mubr.f32.mxu1 %v322_v41 }
  0x8d   : > { %963 = vmatmul.mubr.f32.gmra.mrb[8].mxu0 %v307_v42  ;;  %987 = vmatmul.mubr.f32.gmra.mrb[8].mxu1 %v323_v43 }
  0x8e   : > { %965 = vmatprep.mubr.f32.mxu0 %v308_v44  ;;  %989 = vmatprep.mubr.f32.mxu1 %v324_v45 }
  0x91   : > { %966 = vmatmul.mubr.f32.gmra.mrb[10].mxu0 %v309_v46  ;;  %990 = vmatmul.mubr.f32.gmra.mrb[10].mxu1 %v325_v47 }
  0x92   : > { %968 = vmatprep.mubr.f32.mxu0 %v310_v48  ;;  %992 = vmatprep.mubr.f32.mxu1 %v326_v49 }
  0x95   : > { %969 = vmatmul.mubr.f32.gmra.mrb[12].mxu0 %v311_v50  ;;  %993 = vmatmul.mubr.f32.gmra.mrb[12].mxu1 %v327_v51 }
  0x96   : > { %971 = vmatprep.mubr.f32.mxu0 %v312_v52  ;;  %995 = vmatprep.mubr.f32.mxu1 %v328_v53 }
  0x99   : > { %972 = vmatmul.mubr.f32.gmra.mrb[14].mxu0 %v313_v54  ;;  %996 = vmatmul.mubr.f32.gmra.mrb[14].mxu1 %v329_v55 }
 0x150   : > { %v952_v57 = vpop.f32.mrb[0].mxu0  ;;  %v976_v58 = vpop.f32.mrb[0].mxu1 }
 0x151   : > { %v678_v59 = vadd.f32 %v952_v57, %v1505_v56  ;;  %v694_v60 = vadd.f32 %v976_v58, %v1505_v56  ;;  %v412_v61 = vpop.f32.mrb[1].mxu0  ;;  %v492_v62 = vpop.f32.mrb[1].mxu1 }
 0x152   : > { %v677_v63 = vadd.f32 %v1505_v56, %v412_v61  ;;  %v693_v0 = vadd.f32 %v1505_v56, %v492_v62 }
 0x153   : > { %710 = vst [vmem:[%s1513_s24 + $0x8] sm:$0xff] %v678_v59  ;;  %726 = vst [vmem:[%s1513_s24 + $0x88] sm:$0xff] %v694_v60 }
 0x154   : > { %709 = vst [vmem:[%s1513_s24] sm:$0xff] %v677_v63  ;;  %725 = vst [vmem:[%s1513_s24 + $0x80] sm:$0xff] %v693_v0  ;;  %v955_v1 = vpop.f32.mrb[2].mxu0  ;;  %v979_v2 = vpop.f32.mrb[2].mxu1 }
 0x155   : > { %v680_v3 = vadd.f32 %v955_v1, %v1505_v56  ;;  %v696_v4 = vadd.f32 %v979_v2, %v1505_v56  ;;  %v422_v5 = vpop.f32.mrb[3].mxu0  ;;  %v502_v6 = vpop.f32.mrb[3].mxu1 }
 0x156   : > { %v679_v7 = vadd.f32 %v1505_v56, %v422_v5  ;;  %v695_v8 = vadd.f32 %v1505_v56, %v502_v6 }
 0x157   : > { %712 = vst [vmem:[%s1513_s24 + $0x18] sm:$0xff] %v680_v3  ;;  %728 = vst [vmem:[%s1513_s24 + $0x98] sm:$0xff] %v696_v4 }
 0x158   : > { %711 = vst [vmem:[%s1513_s24 + $0x10] sm:$0xff] %v679_v7  ;;  %727 = vst [vmem:[%s1513_s24 + $0x90] sm:$0xff] %v695_v8  ;;  %v958_v9 = vpop.f32.mrb[4].mxu0  ;;  %v982_v10 = vpop.f32.mrb[4].mxu1 }
 0x159   : > { %v682_v11 = vadd.f32 %v958_v9, %v1505_v56  ;;  %v698_v12 = vadd.f32 %v982_v10, %v1505_v56  ;;  %v432_v13 = vpop.f32.mrb[5].mxu0  ;;  %v512_v14 = vpop.f32.mrb[5].mxu1 }
 0x15a   : > { %v681_v15 = vadd.f32 %v1505_v56, %v432_v13  ;;  %v697_v16 = vadd.f32 %v1505_v56, %v512_v14 }
 0x15b   : > { %714 = vst [vmem:[%s1513_s24 + $0x28] sm:$0xff] %v682_v11  ;;  %730 = vst [vmem:[%s1513_s24 + $0xa8] sm:$0xff] %v698_v12 }
 0x15c   : > { %713 = vst [vmem:[%s1513_s24 + $0x20] sm:$0xff] %v681_v15  ;;  %729 = vst [vmem:[%s1513_s24 + $0xa0] sm:$0xff] %v697_v16  ;;  %v961_v17 = vpop.f32.mrb[6].mxu0  ;;  %v985_v18 = vpop.f32.mrb[6].mxu1 }
 0x15d   : > { %v684_v19 = vadd.f32 %v961_v17, %v1505_v56  ;;  %v700_v20 = vadd.f32 %v985_v18, %v1505_v56  ;;  %v442_v21 = vpop.f32.mrb[7].mxu0  ;;  %v522_v22 = vpop.f32.mrb[7].mxu1 }
 0x15e   : > { %v683_v23 = vadd.f32 %v1505_v56, %v442_v21  ;;  %v699_v24 = vadd.f32 %v1505_v56, %v522_v22 }
 0x15f   : > { %716 = vst [vmem:[%s1513_s24 + $0x38] sm:$0xff] %v684_v19  ;;  %732 = vst [vmem:[%s1513_s24 + $0xb8] sm:$0xff] %v700_v20 }
 0x160   : > { %715 = vst [vmem:[%s1513_s24 + $0x30] sm:$0xff] %v683_v23  ;;  %731 = vst [vmem:[%s1513_s24 + $0xb0] sm:$0xff] %v699_v24  ;;  %v964_v25 = vpop.f32.mrb[8].mxu0  ;;  %v988_v26 = vpop.f32.mrb[8].mxu1 }
 0x161   : > { %v686_v27 = vadd.f32 %v964_v25, %v1505_v56  ;;  %v702_v28 = vadd.f32 %v988_v26, %v1505_v56  ;;  %v452_v29 = vpop.f32.mrb[9].mxu0  ;;  %v532_v30 = vpop.f32.mrb[9].mxu1 }
 0x162   : > { %v685_v31 = vadd.f32 %v1505_v56, %v452_v29  ;;  %v701_v32 = vadd.f32 %v1505_v56, %v532_v30 }
 0x163   : > { %718 = vst [vmem:[%s1513_s24 + $0x48] sm:$0xff] %v686_v27  ;;  %734 = vst [vmem:[%s1513_s24 + $0xc8] sm:$0xff] %v702_v28 }
 0x164   : > { %717 = vst [vmem:[%s1513_s24 + $0x40] sm:$0xff] %v685_v31  ;;  %733 = vst [vmem:[%s1513_s24 + $0xc0] sm:$0xff] %v701_v32  ;;  %v967_v33 = vpop.f32.mrb[10].mxu0  ;;  %v991_v34 = vpop.f32.mrb[10].mxu1 }
 0x165   : > { %v688_v35 = vadd.f32 %v967_v33, %v1505_v56  ;;  %v704_v36 = vadd.f32 %v991_v34, %v1505_v56  ;;  %v462_v37 = vpop.f32.mrb[11].mxu0  ;;  %v542_v38 = vpop.f32.mrb[11].mxu1 }
 0x166   : > { %v687_v39 = vadd.f32 %v1505_v56, %v462_v37  ;;  %v703_v40 = vadd.f32 %v1505_v56, %v542_v38 }
 0x167   : > { %720 = vst [vmem:[%s1513_s24 + $0x58] sm:$0xff] %v688_v35  ;;  %736 = vst [vmem:[%s1513_s24 + $0xd8] sm:$0xff] %v704_v36 }
 0x168   : > { %719 = vst [vmem:[%s1513_s24 + $0x50] sm:$0xff] %v687_v39  ;;  %735 = vst [vmem:[%s1513_s24 + $0xd0] sm:$0xff] %v703_v40  ;;  %v970_v41 = vpop.f32.mrb[12].mxu0  ;;  %v994_v42 = vpop.f32.mrb[12].mxu1 }
 0x169   : > { %v690_v43 = vadd.f32 %v970_v41, %v1505_v56  ;;  %v706_v44 = vadd.f32 %v994_v42, %v1505_v56  ;;  %v472_v45 = vpop.f32.mrb[13].mxu0  ;;  %v552_v46 = vpop.f32.mrb[13].mxu1 }
 0x16a   : > { %v689_v47 = vadd.f32 %v1505_v56, %v472_v45  ;;  %v705_v48 = vadd.f32 %v1505_v56, %v552_v46 }
 0x16b   : > { %722 = vst [vmem:[%s1513_s24 + $0x68] sm:$0xff] %v690_v43  ;;  %738 = vst [vmem:[%s1513_s24 + $0xe8] sm:$0xff] %v706_v44 }
 0x16c   : > { %721 = vst [vmem:[%s1513_s24 + $0x60] sm:$0xff] %v689_v47  ;;  %737 = vst [vmem:[%s1513_s24 + $0xe0] sm:$0xff] %v705_v48  ;;  %v973_v49 = vpop.f32.mrb[14].mxu0  ;;  %v997_v50 = vpop.f32.mrb[14].mxu1 }
 0x16d   : > { %v692_v51 = vadd.f32 %v973_v49, %v1505_v56  ;;  %v708_v52 = vadd.f32 %v997_v50, %v1505_v56  ;;  %v482_v53 = vpop.f32.mrb[15].mxu0  ;;  %v562_v54 = vpop.f32.mrb[15].mxu1 }
 0x16e   : > { %v691_v55 = vadd.f32 %v1505_v56, %v482_v53  ;;  %v707_v57 = vadd.f32 %v1505_v56, %v562_v54 }
 0x16f   : > { %724 = vst [vmem:[%s1513_s24 + $0x78] sm:$0xff] %v692_v51  ;;  %740 = vst [vmem:[%s1513_s24 + $0xf8] sm:$0xff] %v708_v52 }
 0x170   : > { %723 = vst [vmem:[%s1513_s24 + $0x70] sm:$0xff] %v691_v55  ;;  %739 = vst [vmem:[%s1513_s24 + $0xf0] sm:$0xff] %v707_v57 }
 0x171   : > { %1194 = shalt.err (!%p1191_p5)
}
 0x172   : > { %s1195_s6 = scalar_lea.hbm %s1574_s18, 4096  ;;  %s1199_s19 = scalar_lea.hbm %s1634_s3, 8192 }
 0x173   : > { %p1196_p9 = scmp.ne.s32.totalorder %s1574_s18, %s1195_s6  ;;  %p1200_p3 = scmp.lt.u32.totalorder %s1574_s18, %s1634_s3 }
 0x174   : > { %p1201_p7 = scmp.lt.u32.totalorder %s1199_s19, %s1195_s6  ;;  %p1203_p4 = scmp.lt.u32.totalorder %s1195_s6, %s1574_s18 }
 0x175   : > { %p1197_p1 = pnand %p1196_p9, %p1395_p10 }
 0x176   : > { %p1202_p13 = por %p1201_p7, %p1200_p3 }
 0x177   : > { %p1198_p2 = pneg %p1197_p1 }
 0x178   : > { %p1204_p6 = por %p1203_p4, %p1202_p13 }
 0x17a   : > { %p1205_p8 = pnand %p1204_p6, %p1198_p2 }
 0x17c   : > { %1208 = shalt.err (!%p1205_p8)
}
 0x17d   : > { %s1274_s24 = smov 128   ;;  %s1275_s10 = smov 8  }
 0x17e   : > { %1052 = dma.vmem_to_hbm [thread:$0]  (%p1395_p10), %s1576_s11, 4096, %s1574_s18, %s742_s25, %s1274_s24, %s1274_s24, %s1275_s10  }
 0x17f PF: > { %s770_s15 = sand.u32 1, %s1247_s12   ;;  %p1652_p12 = scmp.ne.s32.totalorder %s1642_s23, 0 }
 0x180   : > { %p1653_p11 = scmp.ge.s32.totalorder %s1267_s17, 2  ;;  %s771_s9 = scalar_lea.sflag [#allocation5], %s770_s15 }
 0x182   : > { %p1063_p0 = pnand %p1653_p11, %p1652_p12 }
 0x184   : > { %1242 = dma.done.wait (!%p1063_p0), %s771_s9, 4096  }
 0x185   : > { %1244 = vsyncadd (!%p1063_p0), %s771_s9, 4294963200  ;;  %s20_s17 = sadd.s32 1, %s1267_s17   ;;  %s1654_s12 = smov %s1251_s13 }
 0x186   : > { %p17_p5 = scmp.ge.s32.totalorder %s20_s17, 4   ;;  %s1655_s13 = smov %s1255_s14 }
 0x187   : > { %s1656_s14 = smov %s1404_s5  ;;  %s1657_s15 = smov %s1263_s16 }
 0x188   : > { %s1658_s16 = smov %s1660_s28  ;;  %19 = sbr.rel (!%p17_p5) target bundleno = 7 (0x7), region = 90 }
 0x18f   :  { %776 = vsyncpa [#allocation4], 1 }
 0x190   :  { %778 = vsyncpa [#allocation4 + $0x1], 1 }
 0x191   :  { %779 = vsyncpa [#allocation7], 1 }
 0x192   :  { %780 = vsyncpa [#allocation5], 1 }
 0x193   :  { %782 = vsyncpa [#allocation5 + $0x1], 1 }

</bundles_post_ra>
